<compile_context>
chip_gen: v5e
topology: v5e:2x2
jax: 0.10.0
libtpu: 0.0.40
codegen_flags: <defaults>
</compile_context>

<pallas_src>
import functools
import math

import jax
import jax.numpy as jnp
from jax.experimental import pallas as pl
from jax.experimental.pallas import tpu as pltpu

_BIG = 1e30  # "no window on this side": sigmoid(_BIG/sigma) == 1.0 exactly in f32


# ----------------------------------------------------------------------------
# Pallas kernel: one grid step == one lane-tile of TN points, ALL subdomains
# fused into a single wide, transposed MLP (activations live as (Ht, TN)).
# ----------------------------------------------------------------------------
def _fbpinn_kernel(norm_ref,        # SMEM (2,): [scale, offset]
                   x_ref,           # (1, 1, TN) f32 -- batch on the lane axis
                   consts_ref,      # (3, S, 1) f32: [a_eff, b_eff, b_out]
                   inwb_ref,        # (2, Ht, 1) f32: [w_in, b_in] (concat over s)
                   w_hid_ref,       # (Lm1, Ht, Ht) bf16, block-diag, transposed
                   b_hid_ref,       # (Lm1, Ht, 1) f32
                   w_out_ref,       # (S, Ht) bf16, transposed block layout
                   out_ref,         # (1, 1, TN) f32
                   *, inv_sigma, inv_w, n_hidden_layers):
    x = x_ref[0]                                       # (1, TN)

    # Hoisted normalization: xn = x*scale + offset (global min/max from wrapper).
    xn = x * norm_ref[0] + norm_ref[1]                 # (1, TN)

    # First layer has fan_in = 1: a VPU outer product, no K=1 matmul.
    h = jnp.tanh(inwb_ref[0] * xn + inwb_ref[1])       # (Ht, 1)*(1, TN) -> (Ht, TN)

    # Hidden layers: one (Ht, Ht) @ (Ht, TN) MXU pass per layer, bf16 operands,
    # f32 accumulation; tanh stays f32 (v5e VPU/EUP have no bf16).
    # TODO(synk): when n_hidden_layers == 1, w_hid/b_hid are DMA'd but unused.
    for l in range(n_hidden_layers - 1):
        z = jnp.dot(w_hid_ref[l], h.astype(jnp.bfloat16),
                    preferred_element_type=jnp.float32)
        h = jnp.tanh(z + b_hid_ref[l])                 # (Ht, TN)

    # Output layer: all S per-subdomain outputs at once -> (S, TN).
    u = (jnp.dot(w_out_ref[...], h.astype(jnp.bfloat16),
                 preferred_element_type=jnp.float32)
         + consts_ref[2])

    # Windows: boundary branches are folded into a_eff/b_eff (+-1e30), so the
    # product form is exact; one (S, TN) vreg of sigmoid work.
    win = (jax.nn.sigmoid((x - consts_ref[0]) * inv_sigma)
           * jax.nn.sigmoid((consts_ref[1] - x) * inv_sigma))    # (S, TN)

    # Sublane reduce over subdomains + folded 1/w, lane-dense (1, TN) store.
    out_ref[0] = (jnp.sum(win * u, axis=0, keepdims=True)
                  * inv_w).astype(out_ref.dtype)


# ----------------------------------------------------------------------------
# One-time parameter fusing (hoisted out of the forward path).
# ----------------------------------------------------------------------------
def fuse_params(params, a, b, lflag, rflag):
    """Fuse the S per-subdomain MLPs into one wide, transposed model and pack
    the small per-subdomain constants.  Call ONCE when parameters change."""
    S, _, H = params["w_in"].shape
    Lm1 = params["w_hid"].shape[1]
    Ht = S * H
    eye_s = jnp.eye(S, dtype=jnp.float32)

    # First-layer weights/biases, concatenated over subdomains -> (Ht, 1).
    w_in = params["w_in"].reshape(Ht, 1).astype(jnp.float32)
    b_in = params["b_in"].reshape(Ht, 1).astype(jnp.float32)
    inwb = jnp.stack([w_in, b_in])                               # (2, Ht, 1)

    # Block-diagonal, transposed hidden weights: block s of layer l = w_hid[s,l]^T.
    w_hid_T = jnp.einsum("st,slij->lsjti", eye_s,
                         params["w_hid"].astype(jnp.float32)
                         ).reshape(Lm1, Ht, Ht).astype(jnp.bfloat16)
    b_hid_T = jnp.transpose(params["b_hid"][:, :, 0, :], (1, 0, 2)) \
                 .reshape(Lm1, Ht, 1).astype(jnp.float32)

    # Transposed block output layer: (S, Ht), row s nonzero in cols s*H:(s+1)*H.
    w_out_T = jnp.einsum("st,si->tsi", eye_s,
                         params["w_out"][:, :, 0].astype(jnp.float32)
                         ).reshape(S, Ht).astype(jnp.bfloat16)
    b_out = params["b_out"].reshape(S, 1).astype(jnp.float32)

    # Window constants with the boundary branches folded in.
    a_eff = jnp.where(lflag > 0, a, -_BIG).reshape(S, 1).astype(jnp.float32)
    b_eff = jnp.where(rflag > 0, b, _BIG).reshape(S, 1).astype(jnp.float32)
    consts = jnp.stack([a_eff, b_eff, b_out])                    # (3, S, 1)

    return dict(consts=consts, inwb=inwb, w_hid=w_hid_T, b_hid=b_hid_T,
                w_out=w_out_T)


# ----------------------------------------------------------------------------
# Forward wrapper
# ----------------------------------------------------------------------------
@functools.partial(jax.jit, static_argnames=("sigma", "w", "n_hidden_layers"))
def fbpinn_forward(x, fused, *, sigma, w, n_hidden_layers):
    N = x.shape[0]
    S, Ht = fused["w_out"].shape
    Lm1 = fused["w_hid"].shape[0]

    # Hoisted input normalization: one global min/max reduction, passed to the
    # kernel as SMEM scalars.
    xmin = jnp.min(x)
    xmax = jnp.max(x)
    scale = 2.0 / (xmax - xmin)
    offset = -(xmax + xmin) / (xmax - xmin)
    norm = jnp.stack([scale, offset]).astype(jnp.float32)

    # Batch-on-lanes layout: pad N up to a multiple of 128 and tile as (G, 1, TN).
    n_pad = ((N + 127) // 128) * 128
    TN = 128
    for cand in (2048, 1024, 512, 256, 128):     # one big tile when it fits
        if cand <= n_pad and n_pad % cand == 0:
            TN = cand
            break
    G = n_pad // TN
    # TODO(synk): on v7x prefer >=2 parallel grid steps to use both TensorCores.

    x_flat = x.reshape(-1).astype(jnp.float32)
    if n_pad != N:
        x_flat = jnp.pad(x_flat, (0, n_pad - N))
    x3 = x_flat.reshape(G, 1, TN)

    kernel = functools.partial(
        _fbpinn_kernel,
        inv_sigma=1.0 / float(sigma),
        inv_w=1.0 / float(w),
        n_hidden_layers=int(n_hidden_layers))

    # TODO(synk): single-buffer the constant-index weight specs
    # (pipeline_mode=pl.Buffered(1)) for scaled-up Lm1/Ht configs.
    in_specs = [
        pl.BlockSpec(memory_space=pltpu.MemorySpace.SMEM),        # norm (2,)
        pl.BlockSpec((1, 1, TN), lambda i: (i, 0, 0)),            # x tile
        pl.BlockSpec((3, S, 1), lambda i: (0, 0, 0)),             # a/b/b_out
        pl.BlockSpec((2, Ht, 1), lambda i: (0, 0, 0)),            # w_in/b_in
        pl.BlockSpec((Lm1, Ht, Ht), lambda i: (0, 0, 0)),         # w_hid (bf16)
        pl.BlockSpec((Lm1, Ht, 1), lambda i: (0, 0, 0)),          # b_hid
        pl.BlockSpec((S, Ht), lambda i: (0, 0)),                  # w_out (bf16)
    ]
    out_specs = pl.BlockSpec((1, 1, TN), lambda i: (i, 0, 0))

    out3 = pl.pallas_call(
        kernel,
        out_shape=jax.ShapeDtypeStruct((G, 1, TN), jnp.float32),
        grid=(G,),
        in_specs=in_specs,
        out_specs=out_specs,
        compiler_params=pltpu.CompilerParams(
            dimension_semantics=("parallel",)),
    )(norm, x3, fused["consts"], fused["inwb"], fused["w_hid"],
      fused["b_hid"], fused["w_out"])

    return out3.reshape(n_pad, 1)[:N]


# ----------------------------------------------------------------------------
# Parameter / subdomain setup (plain JAX glue)
# ----------------------------------------------------------------------------
def init_params(key, S, n_hidden_layers, H):
    """Deterministic PyTorch-Linear-style uniform init, stacked over subdomains."""
    Lm1 = max(n_hidden_layers - 1, 1)
    ks = jax.random.split(key, 6)

    def unif(k, shape, fan_in):
        bound = 1.0 / math.sqrt(fan_in)
        return jax.random.uniform(k, shape, jnp.float32, -bound, bound)

    return dict(
        w_in=unif(ks[0], (S, 1, H), 1),
        b_in=unif(ks[1], (S, 1, H), 1),
        w_hid=unif(ks[2], (S, Lm1, H, H), H),
        b_hid=unif(ks[3], (S, Lm1, 1, H), H),
        w_out=unif(ks[4], (S, H, 1), H),
        b_out=unif(ks[5], (S, 1, 1), H),
    )


def make_subdomain_scalars(domain, S):
    """Midpoints-of-overlap [a_i, b_i] and window-branch flags, mirroring
    make_subdomains / window_function branch logic exactly (float == tests)."""
    d0, d1 = float(domain[0]), float(domain[1])
    width = (d1 - d0) / S
    a_l, b_l, lf, rf = [], [], [], []
    for i in range(S):
        a = d0 + i * width
        b = d0 + (i + 1) * width
        a_l.append(a)
        b_l.append(b)
        if a == d0:                  # branch 1: sigmoid((b-x)/sigma) only
            lf.append(0.0); rf.append(1.0)
        elif b == d1:                # branch 2: sigmoid((x-a)/sigma) only
            lf.append(1.0); rf.append(0.0)
        else:                        # branch 3: product
            lf.append(1.0); rf.append(1.0)
    return (jnp.asarray(a_l, jnp.float32), jnp.asarray(b_l, jnp.float32),
            jnp.asarray(lf, jnp.float32), jnp.asarray(rf, jnp.float32))


# ----------------------------------------------------------------------------
# Pure-JAX reference (for correctness check only)
# ----------------------------------------------------------------------------
def reference_forward(x, params, a, b, lflag, rflag, *, sigma, w, n_hidden_layers):
    xmin, xmax = jnp.min(x), jnp.max(x)
    xn = 2.0 * (x - xmin) / (xmax - xmin) - 1.0
    S = a.shape[0]
    out = jnp.zeros_like(x)
    for i in range(S):
        sig_l = jax.nn.sigmoid((x - a[i]) / sigma)
        sig_r = jax.nn.sigmoid((b[i] - x) / sigma)
        win = (jnp.where(lflag[i] > 0, sig_l, 1.0)
               * jnp.where(rflag[i] > 0, sig_r, 1.0))
        h = jnp.tanh(xn * params["w_in"][i] + params["b_in"][i])
        for l in range(n_hidden_layers - 1):
            h = jnp.tanh(h @ params["w_hid"][i, l] + params["b_hid"][i, l])
        u = h @ params["w_out"][i] + params["b_out"][i]
        out = out + win * (u / w)
    return out


# ----------------------------------------------------------------------------
if __name__ == "__main__":
    # Module hyperparameters (small, consistent with FBPPINN_Cos_1D.__init__)
    domain_extrema = (0.0, 1.0)
    n_subdomains = 4
    sigma = 0.05
    n_hidden_layers = 2
    neurons = 32            # S * neurons = 128 -> full MXU / lane width
    w_freq = 15.0
    N = 256                 # number of collocation points

    key = jax.random.PRNGKey(0)
    k_x, k_p = jax.random.split(key)
    x = jax.random.uniform(k_x, (N, 1), dtype=jnp.float32,
                           minval=domain_extrema[0], maxval=domain_extrema[1])

    params = init_params(k_p, n_subdomains, n_hidden_layers, neurons)
    a, b, lflag, rflag = make_subdomain_scalars(domain_extrema, n_subdomains)

    # Parameter fusing is done ONCE, outside the forward hot path.
    fused = fuse_params(params, a, b, lflag, rflag)

    out = fbpinn_forward(x, fused, sigma=sigma, w=w_freq,
                         n_hidden_layers=n_hidden_layers)
    out = jax.block_until_ready(out)

    ref = reference_forward(x, params, a, b, lflag, rflag,
                            sigma=sigma, w=w_freq,
                            n_hidden_layers=n_hidden_layers)

    assert out.shape == (N, 1) and out.dtype == jnp.float32
    # bf16 MXU operands (f32 accumulation) => slightly looser tolerance than f32.
    max_err = float(jnp.max(jnp.abs(out - ref)))
    assert max_err < 5e-3, f"mismatch vs reference: {max_err}"

    print("KERNEL_OK")
</pallas_src>

<mosaic_0001>
module attributes {stable_mosaic.version = 11 : i64} {
  func.func @_fbpinn_kernel(%arg0: i32, %arg1: memref<2xf32, #tpu.memory_space<smem>>, %arg2: memref<1x1x256xf32, #tpu.memory_space<vmem>>, %arg3: memref<3x4x1xf32, #tpu.memory_space<vmem>>, %arg4: memref<2x128x1xf32, #tpu.memory_space<vmem>>, %arg5: memref<1x128x128xbf16, #tpu.memory_space<vmem>>, %arg6: memref<1x128x1xf32, #tpu.memory_space<vmem>>, %arg7: memref<4x128xbf16, #tpu.memory_space<vmem>>, %arg8: memref<1x1x256xf32, #tpu.memory_space<vmem>>) attributes {dimension_semantics = [#tpu.dimension_semantics<parallel>], iteration_bounds = array<i64: 1>, scalar_prefetch = 0 : i64, scratch_operands = 0 : i64, tpu.core_type = #tpu.core_type<tc>, window_params = [{transform_indices = @transform_0, window_bounds = array<i64: 2>}, {transform_indices = @transform_1, window_bounds = array<i64: 1, 1, 256>}, {pipeline_mode = #tpu.pipeline_mode<synchronous>, transform_indices = @transform_2, window_bounds = array<i64: 3, 4, 1>}, {pipeline_mode = #tpu.pipeline_mode<synchronous>, transform_indices = @transform_3, window_bounds = array<i64: 2, 128, 1>}, {pipeline_mode = #tpu.pipeline_mode<synchronous>, transform_indices = @transform_4, window_bounds = array<i64: 1, 128, 128>}, {pipeline_mode = #tpu.pipeline_mode<synchronous>, transform_indices = @transform_5, window_bounds = array<i64: 1, 128, 1>}, {pipeline_mode = #tpu.pipeline_mode<synchronous>, transform_indices = @transform_6, window_bounds = array<i64: 4, 128>}, {transform_indices = @transform_7, window_bounds = array<i64: 1, 1, 256>}]} {
    %c0 = arith.constant 0 : index
    %c0_0 = arith.constant 0 : index
    %c0_1 = arith.constant 0 : index
    %0 = vector.load %arg2[%c0, %c0_0, %c0_1] : memref<1x1x256xf32, #tpu.memory_space<vmem>>, vector<1x1x256xf32>
    %1 = vector.shape_cast %0 : vector<1x1x256xf32> to vector<1x256xf32>
    %c0_2 = arith.constant 0 : index
    %2 = memref.load %arg1[%c0_2] : memref<2xf32, #tpu.memory_space<smem>>
    %3 = vector.broadcast %2 : f32 to vector<1x256xf32>
    %4 = arith.mulf %1, %3 : vector<1x256xf32>
    %c1 = arith.constant 1 : index
    %5 = memref.load %arg1[%c1] : memref<2xf32, #tpu.memory_space<smem>>
    %6 = vector.broadcast %5 : f32 to vector<1x256xf32>
    %7 = arith.addf %4, %6 : vector<1x256xf32>
    %c0_3 = arith.constant 0 : index
    %c0_4 = arith.constant 0 : index
    %c0_5 = arith.constant 0 : index
    %8 = vector.load %arg4[%c0_3, %c0_4, %c0_5] : memref<2x128x1xf32, #tpu.memory_space<vmem>>, vector<1x128x1xf32>
    %9 = vector.shape_cast %8 : vector<1x128x1xf32> to vector<128x1xf32>
    %10 = vector.broadcast %9 : vector<128x1xf32> to vector<128x256xf32>
    %11 = vector.broadcast %7 : vector<1x256xf32> to vector<128x256xf32>
    %12 = arith.mulf %10, %11 : vector<128x256xf32>
    %c1_6 = arith.constant 1 : index
    %c0_7 = arith.constant 0 : index
    %c0_8 = arith.constant 0 : index
    %13 = vector.load %arg4[%c1_6, %c0_7, %c0_8] : memref<2x128x1xf32, #tpu.memory_space<vmem>>, vector<1x128x1xf32>
    %14 = vector.shape_cast %13 : vector<1x128x1xf32> to vector<128x1xf32>
    %15 = vector.broadcast %14 : vector<128x1xf32> to vector<128x256xf32>
    %16 = arith.addf %12, %15 : vector<128x256xf32>
    %17 = math.tanh %16 : vector<128x256xf32>
    %c0_9 = arith.constant 0 : index
    %c0_10 = arith.constant 0 : index
    %c0_11 = arith.constant 0 : index
    %18 = vector.load %arg5[%c0_9, %c0_10, %c0_11] : memref<1x128x128xbf16, #tpu.memory_space<vmem>>, vector<1x128x128xbf16>
    %19 = vector.shape_cast %18 : vector<1x128x128xbf16> to vector<128x128xbf16>
    %20 = arith.truncf %17 : vector<128x256xf32> to vector<128x256xbf16>
    %cst = arith.constant dense<0.000000e+00> : vector<128x256xf32>
    %21 = tpu.matmul %19, %20, %cst {dimension_numbers = #tpu.dot_dimension_numbers<[1], [0], [0], [1], [0, 0, 1, 1], [], []>} : vector<128x128xbf16>, vector<128x256xbf16>, vector<128x256xf32> -> vector<128x256xf32>
    %c0_12 = arith.constant 0 : index
    %c0_13 = arith.constant 0 : index
    %c0_14 = arith.constant 0 : index
    %22 = vector.load %arg6[%c0_12, %c0_13, %c0_14] : memref<1x128x1xf32, #tpu.memory_space<vmem>>, vector<1x128x1xf32>
    %23 = vector.shape_cast %22 : vector<1x128x1xf32> to vector<128x1xf32>
    %24 = vector.broadcast %23 : vector<128x1xf32> to vector<128x256xf32>
    %25 = arith.addf %21, %24 : vector<128x256xf32>
    %26 = math.tanh %25 : vector<128x256xf32>
    %c0_15 = arith.constant 0 : index
    %c0_16 = arith.constant 0 : index
    %27 = vector.load %arg7[%c0_15, %c0_16] : memref<4x128xbf16, #tpu.memory_space<vmem>>, vector<4x128xbf16>
    %28 = arith.truncf %26 : vector<128x256xf32> to vector<128x256xbf16>
    %cst_17 = arith.constant dense<0.000000e+00> : vector<4x256xf32>
    %29 = tpu.matmul %27, %28, %cst_17 {dimension_numbers = #tpu.dot_dimension_numbers<[1], [0], [0], [1], [0, 0, 1, 1], [], []>} : vector<4x128xbf16>, vector<128x256xbf16>, vector<4x256xf32> -> vector<4x256xf32>
    %c2 = arith.constant 2 : index
    %c0_18 = arith.constant 0 : index
    %c0_19 = arith.constant 0 : index
    %30 = vector.load %arg3[%c2, %c0_18, %c0_19] : memref<3x4x1xf32, #tpu.memory_space<vmem>>, vector<1x4x1xf32>
    %31 = vector.shape_cast %30 : vector<1x4x1xf32> to vector<4x1xf32>
    %32 = vector.broadcast %31 : vector<4x1xf32> to vector<4x256xf32>
    %33 = arith.addf %29, %32 : vector<4x256xf32>
    %c0_20 = arith.constant 0 : index
    %c0_21 = arith.constant 0 : index
    %c0_22 = arith.constant 0 : index
    %34 = vector.load %arg3[%c0_20, %c0_21, %c0_22] : memref<3x4x1xf32, #tpu.memory_space<vmem>>, vector<1x4x1xf32>
    %35 = vector.shape_cast %34 : vector<1x4x1xf32> to vector<4x1xf32>
    %36 = vector.broadcast %1 : vector<1x256xf32> to vector<4x256xf32>
    %37 = vector.broadcast %35 : vector<4x1xf32> to vector<4x256xf32>
    %38 = arith.subf %36, %37 : vector<4x256xf32>
    %cst_23 = arith.constant 2.000000e+01 : f32
    %39 = vector.broadcast %cst_23 : f32 to vector<4x256xf32>
    %40 = arith.mulf %38, %39 : vector<4x256xf32>
    %41 = arith.negf %40 : vector<4x256xf32>
    %42 = math.exp %41 : vector<4x256xf32>
    %cst_24 = arith.constant 1.000000e+00 : f32
    %43 = vector.broadcast %cst_24 : f32 to vector<4x256xf32>
    %44 = arith.addf %43, %42 : vector<4x256xf32>
    %45 = arith.divf %43, %44 : vector<4x256xf32>
    %c1_25 = arith.constant 1 : index
    %c0_26 = arith.constant 0 : index
    %c0_27 = arith.constant 0 : index
    %46 = vector.load %arg3[%c1_25, %c0_26, %c0_27] : memref<3x4x1xf32, #tpu.memory_space<vmem>>, vector<1x4x1xf32>
    %47 = vector.shape_cast %46 : vector<1x4x1xf32> to vector<4x1xf32>
    %48 = vector.broadcast %47 : vector<4x1xf32> to vector<4x256xf32>
    %49 = vector.broadcast %1 : vector<1x256xf32> to vector<4x256xf32>
    %50 = arith.subf %48, %49 : vector<4x256xf32>
    %cst_28 = arith.constant 2.000000e+01 : f32
    %51 = vector.broadcast %cst_28 : f32 to vector<4x256xf32>
    %52 = arith.mulf %50, %51 : vector<4x256xf32>
    %53 = arith.negf %52 : vector<4x256xf32>
    %54 = math.exp %53 : vector<4x256xf32>
    %cst_29 = arith.constant 1.000000e+00 : f32
    %55 = vector.broadcast %cst_29 : f32 to vector<4x256xf32>
    %56 = arith.addf %55, %54 : vector<4x256xf32>
    %57 = arith.divf %55, %56 : vector<4x256xf32>
    %58 = arith.mulf %45, %57 : vector<4x256xf32>
    %59 = arith.mulf %58, %33 : vector<4x256xf32>
    %cst_30 = arith.constant dense<0.000000e+00> : vector<256xf32>
    %60 = vector.multi_reduction <add>, %59, %cst_30 [0] : vector<4x256xf32> to vector<256xf32>
    %61 = vector.shape_cast %60 : vector<256xf32> to vector<1x256xf32>
    %cst_31 = arith.constant 0.0666666701 : f32
    %62 = vector.broadcast %cst_31 : f32 to vector<1x256xf32>
    %63 = arith.mulf %61, %62 : vector<1x256xf32>
    %c0_32 = arith.constant 0 : index
    %c0_33 = arith.constant 0 : index
    %c0_34 = arith.constant 0 : index
    %64 = vector.load %arg8[%c0_32, %c0_33, %c0_34] : memref<1x1x256xf32, #tpu.memory_space<vmem>>, vector<1x1x256xf32>
    %65 = vector.shape_cast %64 : vector<1x1x256xf32> to vector<1x256xf32>
    %66 = vector.shape_cast %63 : vector<1x256xf32> to vector<1x1x256xf32>
    tpu.vector_store %arg8[%c0_32, %c0_33, %c0_34], %66 {strides = array<i32>} : memref<1x1x256xf32, #tpu.memory_space<vmem>>, vector<1x1x256xf32>,
    return
  }
  func.func @transform_0(%arg0: i32) -> i32 {
    %c0_i32 = arith.constant 0 : i32
    %c0_i32_0 = arith.constant 0 : i32
    return %c0_i32 : i32
  }
  func.func @transform_1(%arg0: i32) -> (i32, i32, i32) {
    %c0_i32 = arith.constant 0 : i32
    %c0_i32_0 = arith.constant 0 : i32
    %c0_i32_1 = arith.constant 0 : i32
    return %arg0, %c0_i32, %c0_i32_0 : i32, i32, i32
  }
  func.func @transform_2(%arg0: i32) -> (i32, i32, i32) {
    %c0_i32 = arith.constant 0 : i32
    %c0_i32_0 = arith.constant 0 : i32
    %c0_i32_1 = arith.constant 0 : i32
    %c0_i32_2 = arith.constant 0 : i32
    return %c0_i32, %c0_i32_0, %c0_i32_1 : i32, i32, i32
  }
  func.func @transform_3(%arg0: i32) -> (i32, i32, i32) {
    %c0_i32 = arith.constant 0 : i32
    %c0_i32_0 = arith.constant 0 : i32
    %c0_i32_1 = arith.constant 0 : i32
    %c0_i32_2 = arith.constant 0 : i32
    return %c0_i32, %c0_i32_0, %c0_i32_1 : i32, i32, i32
  }
  func.func @transform_4(%arg0: i32) -> (i32, i32, i32) {
    %c0_i32 = arith.constant 0 : i32
    %c0_i32_0 = arith.constant 0 : i32
    %c0_i32_1 = arith.constant 0 : i32
    %c0_i32_2 = arith.constant 0 : i32
    return %c0_i32, %c0_i32_0, %c0_i32_1 : i32, i32, i32
  }
  func.func @transform_5(%arg0: i32) -> (i32, i32, i32) {
    %c0_i32 = arith.constant 0 : i32
    %c0_i32_0 = arith.constant 0 : i32
    %c0_i32_1 = arith.constant 0 : i32
    %c0_i32_2 = arith.constant 0 : i32
    return %c0_i32, %c0_i32_0, %c0_i32_1 : i32, i32, i32
  }
  func.func @transform_6(%arg0: i32) -> (i32, i32) {
    %c0_i32 = arith.constant 0 : i32
    %c0_i32_0 = arith.constant 0 : i32
    %c0_i32_1 = arith.constant 0 : i32
    return %c0_i32, %c0_i32_0 : i32, i32
  }
  func.func @transform_7(%arg0: i32) -> (i32, i32, i32) {
    %c0_i32 = arith.constant 0 : i32
    %c0_i32_0 = arith.constant 0 : i32
    %c0_i32_1 = arith.constant 0 : i32
    return %arg0, %c0_i32, %c0_i32_0 : i32, i32, i32
  }
}

</mosaic_0001>

<bundles_post_ra>
// kernel: fbpinn_forward.1
= control target key start
LH: loop header
LB: loop body
LE: loop exit
PB: predicated region body
PF: predicated region fallthrough
CT: control target
= control target key end

     0   :  { %12 = vsyncpa [#allocation4], 0  ;;  %s1478_s0 = inlined_call_operand.vmem [shape: f32[2], index: 0, kind: input, shape index: {}]   ;;  %s1479_s1 = inlined_call_operand.vmem [shape: f32[1,1,256], index: 1, kind: input, shape index: {}]   ;;  %s1480_s2 = inlined_call_operand.vmem [shape: f32[3,4,1], index: 2, kind: input, shape index: {}]   ;;  %s1481_s3 = inlined_call_operand.vmem [shape: f32[2,128,1], index: 3, kind: input, shape index: {}]   ;;  %s1482_s4 = inlined_call_operand.vmem [shape: bf16[1,128,128], index: 4, kind: input, shape index: {}]   ;;  %s1483_s5 = inlined_call_operand.vmem [shape: f32[1,128,1], index: 5, kind: input, shape index: {}]   ;;  %s1484_s6 = inlined_call_operand.vmem [shape: bf16[4,128], index: 6, kind: input, shape index: {}]   ;;  %s1485_s7 = inlined_call_operand.hbm [shape: f32[1,1,256], index: 7, kind: output, shape index: {}]  }
   0x1   :  { %13 = vsyncpa [#allocation3], 0  ;;  %s19_s26 = sshll.u32 %s1478_s0, 4  ;;  %s1117_s27 = smov [#allocation2]   ;;  %s20_s26 = int_to_ptr.vmem [resolvable:$true] %s19_s26 }
   0x2   :  { %22 = dma.vmem_to_smem %s20_s26, 16, %s1117_s27, [#allocation4]  }
   0x3   :  { %1113 = dma.done.wait [#allocation4], 16  }
   0x4   :  { %1114 = vsyncadd [#allocation4], 4294967280 }
   0x5   :  { %39 = sfence }
   0x6   :  { %v863_v0 = vld [vmem:[%s1481_s3 + $0xf0] sm:$0xff]  ;;  %v59_v2 = vld [vmem:[%s1481_s3 + $0x60] sm:$0xff]  ;;  %v1118_v3 = vmov 0   ;;  %v864_v4 = vld [vmem:[%s1481_s3 + $0xf8] sm:$0xff]  ;;  %s41_s10 = sld [smem:[#allocation2]] }
   0x7   :  { %v61_v1 = vld [vmem:[%s1481_s3 + $0x70] sm:$0xff]  ;;  %932 = vset.pattern.permute.xlu2 %v1118_v3  ;;  %931 = vset.pattern.permute.xlu1 %v1118_v3  ;;  %v62_v5 = vld [vmem:[%s1481_s3 + $0x78] sm:$0xff]  ;;  %v60_v6 = vld [vmem:[%s1481_s3 + $0x68] sm:$0xff]  ;;  %s848_s0 = sld [smem:[#allocation2 + $0x1]] }
   0x8   :  { %930 = vset.pattern.permute.xlu0 %v1118_v3  ;;  %269 = vperm.xlu1 %931, %v863_v0   ;;  %v862_v7 = vld [vmem:[%s1481_s3 + $0xe8] sm:$0xff]  ;;  %v861_v8 = vld [vmem:[%s1481_s3 + $0xe0] sm:$0xff]  ;;  %v57_v9 = vld [vmem:[%s1481_s3 + $0x50] sm:$0xff] }
   0x9   :  { %135 = vperm.xlu0 %930, %v61_v1   ;;  %125 = vperm.xlu2 %932, %v59_v2   ;;  %v859_v10 = vld [vmem:[%s1481_s3 + $0xd0] sm:$0xff]  ;;  %v58_v11 = vld [vmem:[%s1481_s3 + $0x58] sm:$0xff]  ;;  %v56_v13 = vld [vmem:[%s1481_s3 + $0x48] sm:$0xff] }
   0xa   :  { %v860_v12 = vld [vmem:[%s1481_s3 + $0xd8] sm:$0xff]  ;;  %v857_v14 = vld [vmem:[%s1481_s3 + $0xc0] sm:$0xff]  ;;  %v53_v16 = vld [vmem:[%s1481_s3 + $0x30] sm:$0xff] }
   0xb   :  { %v55_v15 = vld [vmem:[%s1481_s3 + $0x40] sm:$0xff]  ;;  %v858_v17 = vld [vmem:[%s1481_s3 + $0xc8] sm:$0xff]  ;;  %v54_v18 = vld [vmem:[%s1481_s3 + $0x38] sm:$0xff] }
   0xc   :  { %v856_v19 = vld [vmem:[%s1481_s3 + $0xb8] sm:$0xff]  ;;  %v855_v20 = vld [vmem:[%s1481_s3 + $0xb0] sm:$0xff]  ;;  %v51_v21 = vld [vmem:[%s1481_s3 + $0x20] sm:$0xff]  ;;  %v42_v45 = vstv %s41_s10 }
   0xd   :  { %v853_v22 = vld [vmem:[%s1481_s3 + $0xa0] sm:$0xff]  ;;  %v52_v23 = vld [vmem:[%s1481_s3 + $0x28] sm:$0xff]  ;;  %v50_v25 = vld [vmem:[%s1481_s3 + $0x18] sm:$0xff]  ;;  %v45_v47 = vstv %s848_s0 }
   0xe   :  { %v854_v24 = vld [vmem:[%s1481_s3 + $0xa8] sm:$0xff]  ;;  %v851_v26 = vld [vmem:[%s1481_s3 + $0x90] sm:$0xff]  ;;  %v47_v28 = vld [vmem:[%s1481_s3] sm:$0xff] }
   0xf   :  { %v49_v27 = vld [vmem:[%s1481_s3 + $0x10] sm:$0xff]  ;;  %v852_v29 = vld [vmem:[%s1481_s3 + $0x98] sm:$0xff]  ;;  %v48_v30 = vld [vmem:[%s1481_s3 + $0x8] sm:$0xff] }
  0x10   :  { %274 = vperm.xlu1 %931, %v864_v4   ;;  %v850_v31 = vld [vmem:[%s1481_s3 + $0x88] sm:$0xff]  ;;  %v849_v32 = vld [vmem:[%s1481_s3 + $0x80] sm:$0xff]  ;;  %v387_v33 = vld [vmem:[%s1483_s5 + $0x70] sm:$0xff]  ;;  %s838_s3 = sshll.u32 %s1485_s7, 4  ;;  %s839_s3 = int_to_ptr.hbm [resolvable:$true] %s838_s3 }
  0x11   :  { %140 = vperm.xlu0 %930, %v62_v5   ;;  %130 = vperm.xlu2 %932, %v60_v6   ;;  %v385_v34 = vld [vmem:[%s1483_s5 + $0x60] sm:$0xff]  ;;  %v388_v35 = vld [vmem:[%s1483_s5 + $0x78] sm:$0xff]  ;;  %v386_v36 = vld [vmem:[%s1483_s5 + $0x68] sm:$0xff] }
  0x12   :  { %v384_v37 = vld [vmem:[%s1483_s5 + $0x58] sm:$0xff]  ;;  %v383_v38 = vld [vmem:[%s1483_s5 + $0x50] sm:$0xff]  ;;  %v381_v39 = vld [vmem:[%s1483_s5 + $0x40] sm:$0xff] }
  0x13   :  { %v379_v41 = vld [vmem:[%s1483_s5 + $0x30] sm:$0xff]  ;;  %v382_v42 = vld [vmem:[%s1483_s5 + $0x48] sm:$0xff]  ;;  %v380_v43 = vld [vmem:[%s1483_s5 + $0x38] sm:$0xff] }
  0x14   :  { %v1292_v44 = vld [vmem:[%s1479_s1] sm:$0x3]  ;;  %v378_v48 = vld [vmem:[%s1483_s5 + $0x28] sm:$0xff]  ;;  %v375_v52 = vld [vmem:[%s1483_s5 + $0x10] sm:$0xff] }
  0x15   :  { %v43_v46 = vmul.f32 %v42_v45, %v1292_v44  ;;  %v377_v51 = vld [vmem:[%s1483_s5 + $0x20] sm:$0xff]  ;;  %v376_v59 = vld [vmem:[%s1483_s5 + $0x18] sm:$0xff]  ;;  %v374_v60 = vld [vmem:[%s1483_s5 + $0x8] sm:$0xff] }
  0x16   :  { %v373_v57 = vld [vmem:[%s1483_s5] sm:$0xff] }
  0x17   :  { %v46_v49 = vadd.f32 %v45_v47, %v43_v46  ;;  %v900_v5 = vld [vmem:[%s1480_s2 + $0x4] sm:$0xf] }
  0x18   :  { %264 = vperm.xlu1 %931, %v862_v7  }
  0x19   :  { %259 = vperm.xlu0 %930, %v861_v8   ;;  %115 = vperm.xlu2 %932, %v57_v9   ;;  %v1304_v53 = vperm.slane %v46_v49, 0  ;;  %v1306_v55 = vperm.slane %v46_v49, 1  ;;  %v697_v8 = vld [vmem:[%s1480_s2] sm:$0xf]  ;;  %v897_v9 = vld [vmem:[%s1480_s2 + $0x8] sm:$0xf] }
  0x20   :  { %249 = vperm.xlu1 %931, %v859_v10  }
  0x21   :  { %120 = vperm.xlu0 %930, %v58_v11   ;;  %254 = vperm.xlu2 %932, %v860_v12  }
  0x28   :  { %110 = vperm.xlu1 %931, %v56_v13  }
  0x29   :  { %239 = vperm.xlu2 %932, %v857_v14   ;;  %105 = vperm.xlu0 %930, %v55_v15  }
  0x30   :  { %95 = vperm.xlu1 %931, %v53_v16  }
  0x31   :  { %244 = vperm.xlu0 %930, %v858_v17   ;;  %100 = vperm.xlu2 %932, %v54_v18  }
  0x38   :  { %234 = vperm.xlu1 %931, %v856_v19  }
  0x39   :  { %229 = vperm.xlu0 %930, %v855_v20   ;;  %85 = vperm.xlu2 %932, %v51_v21  }
  0x40   :  { %219 = vperm.xlu1 %931, %v853_v22  }
  0x41   :  { %90 = vperm.xlu0 %930, %v52_v23   ;;  %224 = vperm.xlu2 %932, %v854_v24  }
  0x48   :  { %80 = vperm.xlu1 %931, %v50_v25  }
  0x49   :  { %209 = vperm.xlu2 %932, %v851_v26   ;;  %75 = vperm.xlu0 %930, %v49_v27  }
  0x50   :  { %65 = vperm.xlu1 %931, %v47_v28  }
  0x51   :  { %214 = vperm.xlu0 %930, %v852_v29   ;;  %70 = vperm.xlu2 %932, %v48_v30  }
  0x58   :  { %204 = vperm.xlu1 %931, %v850_v31  }
  0x59   :  { %199 = vperm.xlu0 %930, %v849_v32   ;;  %461 = vperm.xlu2 %932, %v387_v33  }
  0x60   :  { %451 = vperm.xlu1 %931, %v385_v34  }
  0x61   :  { %466 = vperm.xlu0 %930, %v388_v35   ;;  %456 = vperm.xlu2 %932, %v386_v36  }
  0x63   :  { %v126_v40 = vpop.permute.xlu2 %125 }
  0x64   :  { %v172_v12 = vmul.f32 %v1304_v53, %v126_v40  ;;  %v173_v13 = vmul.f32 %v1306_v55, %v126_v40 }
  0x68   :  { %446 = vperm.xlu1 %931, %v384_v37  }
  0x69   :  { %441 = vperm.xlu0 %930, %v383_v38   ;;  %431 = vperm.xlu2 %932, %v381_v39  }
  0x6b   :  { %v131_v50 = vpop.permute.xlu2 %130 }
  0x6c   :  { %v174_v10 = vmul.f32 %v1304_v53, %v131_v50  ;;  %v175_v11 = vmul.f32 %v1306_v55, %v131_v50 }
  0x70   :  { %421 = vperm.xlu1 %931, %v379_v41  }
  0x71   :  { %436 = vperm.xlu0 %930, %v382_v42   ;;  %426 = vperm.xlu2 %932, %v380_v43  }
  0x73   :  { %v116_v62 = vpop.permute.xlu2 %115 }
  0x74   :  { %v168_v27 = vmul.f32 %v1304_v53, %v116_v62  ;;  %v169_v28 = vmul.f32 %v1306_v55, %v116_v62 }
  0x78   :  { %416 = vperm.xlu1 %931, %v378_v48  }
  0x79   :  { %411 = vperm.xlu0 %930, %v377_v51   ;;  %401 = vperm.xlu2 %932, %v375_v52  }
  0x7a   :  { %v270_v54 = vpop.permute.xlu1 %269 }
  0x7b   :  { %v136_v56 = vpop.permute.xlu0 %135  ;;  %v255_v14 = vpop.permute.xlu2 %254 }
  0x7c   :  { %v176_v58 = vmul.f32 %v1304_v53, %v136_v56  ;;  %v177_v61 = vmul.f32 %v1306_v55, %v136_v56 }
  0x7e   :  { %v305_v63 = vadd.f32 %v270_v54, %v176_v58  ;;  %v306_v1 = vadd.f32 %v270_v54, %v177_v61 }
  0x80   :  { %391 = vperm.xlu1 %931, %v373_v57   ;;  %933 = vtanh.f32 %v305_v63 }
  0x81   :  { %406 = vperm.xlu0 %930, %v376_v59   ;;  %396 = vperm.xlu2 %932, %v374_v60   ;;  %935 = vtanh.f32 %v306_v1 }
  0x82   :  { %v275_v0 = vpop.permute.xlu1 %274 }
  0x83   :  { %v141_v2 = vpop.permute.xlu0 %140  ;;  %v240_v35 = vpop.permute.xlu2 %239 }
  0x84   :  { %v178_v3 = vmul.f32 %v1304_v53, %v141_v2  ;;  %v179_v4 = vmul.f32 %v1306_v55, %v141_v2 }
  0x86   :  { %v307_v6 = vadd.f32 %v275_v0, %v178_v3  ;;  %v308_v7 = vadd.f32 %v275_v0, %v179_v4  ;;  %v934_v19 = vpop.eup %933 }
  0x87   :  { %v936_v22 = vpop.eup %935 }
  0x88   :  { %937 = vtanh.f32 %v307_v6  ;;  %754 = vperm.xlu1 %931, %v900_v5  }
  0x89   :  { %939 = vtanh.f32 %v308_v7  ;;  %705 = vperm.xlu0 %930, %v697_v8   ;;  %668 = vperm.xlu2 %932, %v897_v9  }
  0x8a   :  { %v265_v15 = vpop.permute.xlu1 %264 }
  0x8b   :  { %v303_v16 = vadd.f32 %v265_v15, %v174_v10  ;;  %v304_v17 = vadd.f32 %v265_v15, %v175_v11  ;;  %v260_v18 = vpop.permute.xlu0 %259  ;;  %v101_v52 = vpop.permute.xlu2 %100 }
  0x8c   :  { %v301_v20 = vadd.f32 %v260_v18, %v172_v12  ;;  %v302_v21 = vadd.f32 %v260_v18, %v173_v13  ;;  %v162_v3 = vmul.f32 %v1304_v53, %v101_v52  ;;  %v163_v5 = vmul.f32 %v1306_v55, %v101_v52 }
  0x8d   :  { %941 = vtanh.f32 %v303_v16 }
  0x8e   :  { %v938_v23 = vpop.eup %937  ;;  %943 = vtanh.f32 %v304_v17 }
  0x8f   :  { %v940_v24 = vpop.eup %939  ;;  %945 = vtanh.f32 %v301_v20  ;;  %v371_v25 = vpack.c.bf16 %v938_v23, %v934_v19 }
  0x90   :  { %947 = vtanh.f32 %v302_v21  ;;  %v372_v26 = vpack.c.bf16 %v940_v24, %v936_v22 }
  0x91   :  { %517 = vmatpush.bf16.msra.mxu0 %v371_v25  ;;  %911 = vmatpush.bf16.msra.mxu2 %v371_v25 }
  0x92   :  { %566 = vmatpush.bf16.msra.mxu1 %v372_v26  ;;  %919 = vmatpush.bf16.msra.mxu3 %v372_v26  ;;  %v250_v29 = vpop.permute.xlu1 %249 }
  0x93   :  { %v942_v30 = vpop.eup %941  ;;  %v297_v31 = vadd.f32 %v250_v29, %v168_v27  ;;  %v298_v32 = vadd.f32 %v250_v29, %v169_v28  ;;  %v121_v33 = vpop.permute.xlu0 %120 }
  0x94   :  { %v944_v34 = vpop.eup %943  ;;  %v170_v36 = vmul.f32 %v1304_v53, %v121_v33  ;;  %v171_v37 = vmul.f32 %v1306_v55, %v121_v33  ;;  %v86_v2 = vpop.permute.xlu2 %85 }
  0x95   :  { %v946_v38 = vpop.eup %945  ;;  %949 = vtanh.f32 %v297_v31  ;;  %v156_v19 = vmul.f32 %v1304_v53, %v86_v2  ;;  %v157_v20 = vmul.f32 %v1306_v55, %v86_v2 }
  0x96   :  { %v948_v39 = vpop.eup %947  ;;  %v299_v40 = vadd.f32 %v255_v14, %v170_v36  ;;  %v300_v41 = vadd.f32 %v255_v14, %v171_v37  ;;  %v369_v42 = vpack.c.bf16 %v942_v30, %v946_v38  ;;  %951 = vtanh.f32 %v298_v32 }
  0x97   :  { %v370_v43 = vpack.c.bf16 %v944_v34, %v948_v39 }
  0x98   :  { %953 = vtanh.f32 %v299_v40  ;;  %518 = vmatpush.bf16.msra.mxu0 %v369_v42  ;;  %912 = vmatpush.bf16.msra.mxu2 %v369_v42 }
  0x99   :  { %955 = vtanh.f32 %v300_v41  ;;  %567 = vmatpush.bf16.msra.mxu1 %v370_v43  ;;  %920 = vmatpush.bf16.msra.mxu3 %v370_v43 }
  0x9a   :  { %v111_v45 = vpop.permute.xlu1 %110 }
  0x9b   :  { %v106_v46 = vpop.permute.xlu0 %105  ;;  %v950_v47 = vpop.eup %949  ;;  %v166_v60 = vmul.f32 %v1304_v53, %v111_v45  ;;  %v167_v61 = vmul.f32 %v1306_v55, %v111_v45 }
  0x9c   :  { %v164_v48 = vmul.f32 %v1304_v53, %v106_v46  ;;  %v952_v49 = vpop.eup %951  ;;  %v165_v50 = vmul.f32 %v1306_v55, %v106_v46  ;;  %v225_v21 = vpop.permute.xlu2 %224 }
  0x9e   :  { %v954_v51 = vpop.eup %953  ;;  %v293_v57 = vadd.f32 %v240_v35, %v164_v48  ;;  %v294_v59 = vadd.f32 %v240_v35, %v165_v50 }
  0x9f   :  { %v956_v54 = vpop.eup %955  ;;  %v367_v56 = vpack.c.bf16 %v954_v51, %v950_v47 }
  0xa0   :  { %v368_v58 = vpack.c.bf16 %v956_v54, %v952_v49  ;;  %957 = vtanh.f32 %v293_v57 }
  0xa1   :  { %519 = vmatpush.bf16.msra.mxu0 %v367_v56  ;;  %913 = vmatpush.bf16.msra.mxu2 %v367_v56  ;;  %959 = vtanh.f32 %v294_v59 }
  0xa2   :  { %568 = vmatpush.bf16.msra.mxu1 %v368_v58  ;;  %921 = vmatpush.bf16.msra.mxu3 %v368_v58  ;;  %v96_v62 = vpop.permute.xlu1 %95 }
  0xa3   :  { %v245_v63 = vpop.permute.xlu0 %244  ;;  %v160_v6 = vmul.f32 %v1304_v53, %v96_v62  ;;  %v161_v7 = vmul.f32 %v1306_v55, %v96_v62 }
  0xa4   :  { %v295_v0 = vadd.f32 %v245_v63, %v166_v60  ;;  %v296_v1 = vadd.f32 %v245_v63, %v167_v61  ;;  %v210_v39 = vpop.permute.xlu2 %209 }
  0xa6   :  { %961 = vtanh.f32 %v295_v0  ;;  %v958_v4 = vpop.eup %957 }
  0xa7   :  { %963 = vtanh.f32 %v296_v1  ;;  %v960_v9 = vpop.eup %959 }
  0xaa   :  { %v235_v8 = vpop.permute.xlu1 %234 }
  0xab   :  { %v230_v10 = vpop.permute.xlu0 %229  ;;  %v291_v11 = vadd.f32 %v235_v8, %v162_v3  ;;  %v292_v15 = vadd.f32 %v235_v8, %v163_v5 }
  0xac   :  { %v962_v12 = vpop.eup %961  ;;  %v289_v13 = vadd.f32 %v230_v10, %v160_v6  ;;  %v290_v14 = vadd.f32 %v230_v10, %v161_v7  ;;  %v71_v58 = vpop.permute.xlu2 %70 }
  0xad   :  { %v964_v16 = vpop.eup %963  ;;  %965 = vtanh.f32 %v291_v11  ;;  %v365_v17 = vpack.c.bf16 %v962_v12, %v958_v4  ;;  %v150_v59 = vmul.f32 %v1304_v53, %v71_v58  ;;  %v151_v61 = vmul.f32 %v1306_v55, %v71_v58 }
  0xae   :  { %967 = vtanh.f32 %v289_v13  ;;  %v366_v18 = vpack.c.bf16 %v964_v16, %v960_v9 }
  0xaf   :  { %969 = vtanh.f32 %v290_v14  ;;  %520 = vmatpush.bf16.msra.mxu0 %v365_v17  ;;  %914 = vmatpush.bf16.msra.mxu2 %v365_v17  ;;  %v903_v14 = vld [vmem:[%s1482_s4] sm:$0xff]  ;;  %v904_v17 = vld [vmem:[%s1482_s4 + $0x8] sm:$0xff] }
  0xb0   :  { %971 = vtanh.f32 %v292_v15  ;;  %569 = vmatpush.bf16.msra.mxu1 %v366_v18  ;;  %922 = vmatpush.bf16.msra.mxu3 %v366_v18  ;;  %v908_v15 = vld [vmem:[%s1482_s4 + $0x28] sm:$0xff]  ;;  %v909_v18 = vld [vmem:[%s1482_s4 + $0x30] sm:$0xff] }
  0xb2   :  { %v220_v22 = vpop.permute.xlu1 %219 }
  0xb3   :  { %v966_v23 = vpop.eup %965  ;;  %v285_v24 = vadd.f32 %v220_v22, %v156_v19  ;;  %v286_v25 = vadd.f32 %v220_v22, %v157_v20  ;;  %v91_v26 = vpop.permute.xlu0 %90  ;;  %v905_v19 = vld [vmem:[%s1482_s4 + $0x10] sm:$0xff]  ;;  %v910_v20 = vld [vmem:[%s1482_s4 + $0x38] sm:$0xff]  ;;  %v907_v22 = vld [vmem:[%s1482_s4 + $0x20] sm:$0xff] }
  0xb4   :  { %v968_v27 = vpop.eup %967  ;;  %v158_v28 = vmul.f32 %v1304_v53, %v91_v26  ;;  %v159_v29 = vmul.f32 %v1306_v55, %v91_v26 }
  0xb5   :  { %v970_v30 = vpop.eup %969  ;;  %v363_v31 = vpack.c.bf16 %v966_v23, %v968_v27  ;;  %973 = vtanh.f32 %v285_v24  ;;  %v462_v23 = vpop.permute.xlu2 %461 }
  0xb6   :  { %v972_v32 = vpop.eup %971  ;;  %v287_v33 = vadd.f32 %v225_v21, %v158_v28  ;;  %v288_v34 = vadd.f32 %v225_v21, %v159_v29  ;;  %975 = vtanh.f32 %v286_v25  ;;  %v906_v21 = vld [vmem:[%s1482_s4 + $0x18] sm:$0xff] }
  0xb7   :  { %521 = vmatpush.bf16.msra.mxu0 %v363_v31  ;;  %915 = vmatpush.bf16.msra.mxu2 %v363_v31  ;;  %v364_v35 = vpack.c.bf16 %v972_v32, %v970_v30 }
  0xb8   :  { %977 = vtanh.f32 %v287_v33 }
  0xb9   :  { %979 = vtanh.f32 %v288_v34  ;;  %570 = vmatpush.bf16.msra.mxu1 %v364_v35  ;;  %923 = vmatpush.bf16.msra.mxu3 %v364_v35 }
  0xba   :  { %v81_v36 = vpop.permute.xlu1 %80 }
  0xbb   :  { %v76_v37 = vpop.permute.xlu0 %75  ;;  %v974_v38 = vpop.eup %973  ;;  %v154_v50 = vmul.f32 %v1304_v53, %v81_v36  ;;  %v155_v51 = vmul.f32 %v1306_v55, %v81_v36 }
  0xbc   :  { %v152_v40 = vmul.f32 %v1304_v53, %v76_v37  ;;  %v976_v41 = vpop.eup %975  ;;  %v153_v42 = vmul.f32 %v1306_v55, %v76_v37 }
  0xbd   :  { %v457_v25 = vpop.permute.xlu2 %456 }
  0xbe   :  { %v978_v43 = vpop.eup %977  ;;  %v281_v47 = vadd.f32 %v210_v39, %v152_v40  ;;  %v282_v49 = vadd.f32 %v210_v39, %v153_v42 }
  0xbf   :  { %v980_v45 = vpop.eup %979  ;;  %v361_v46 = vpack.c.bf16 %v978_v43, %v974_v38 }
  0xc0   :  { %v362_v48 = vpack.c.bf16 %v980_v45, %v976_v41  ;;  %981 = vtanh.f32 %v281_v47 }
  0xc1   :  { %522 = vmatpush.bf16.msra.mxu0 %v361_v46  ;;  %916 = vmatpush.bf16.msra.mxu2 %v361_v46  ;;  %983 = vtanh.f32 %v282_v49 }
  0xc2   :  { %571 = vmatpush.bf16.msra.mxu1 %v362_v48  ;;  %924 = vmatpush.bf16.msra.mxu3 %v362_v48  ;;  %v66_v52 = vpop.permute.xlu1 %65 }
  0xc3   :  { %v215_v54 = vpop.permute.xlu0 %214  ;;  %v148_v62 = vmul.f32 %v1304_v53, %v66_v52  ;;  %v149_v63 = vmul.f32 %v1306_v55, %v66_v52 }
  0xc4   :  { %v283_v56 = vadd.f32 %v215_v54, %v154_v50  ;;  %v284_v57 = vadd.f32 %v215_v54, %v155_v51 }
  0xc5   :  { %v1386_v27 = vpop.permute.xlu2 %431 }
  0xc6   :  { %985 = vtanh.f32 %v283_v56  ;;  %v982_v60 = vpop.eup %981 }
  0xc7   :  { %987 = vtanh.f32 %v284_v57  ;;  %v984_v1 = vpop.eup %983 }
  0xca   :  { %v205_v0 = vpop.permute.xlu1 %204 }
  0xcb   :  { %v200_v2 = vpop.permute.xlu0 %199  ;;  %v279_v3 = vadd.f32 %v205_v0, %v150_v59  ;;  %v280_v7 = vadd.f32 %v205_v0, %v151_v61 }
  0xcc   :  { %v986_v4 = vpop.eup %985  ;;  %v277_v5 = vadd.f32 %v200_v2, %v148_v62  ;;  %v278_v6 = vadd.f32 %v200_v2, %v149_v63 }
  0xcd   :  { %v988_v8 = vpop.eup %987  ;;  %989 = vtanh.f32 %v279_v3  ;;  %v359_v9 = vpack.c.bf16 %v986_v4, %v982_v60  ;;  %v1390_v29 = vpop.permute.xlu2 %426 }
  0xce   :  { %991 = vtanh.f32 %v277_v5  ;;  %v360_v10 = vpack.c.bf16 %v988_v8, %v984_v1 }
  0xcf   :  { %993 = vtanh.f32 %v278_v6  ;;  %523 = vmatpush.bf16.msra.mxu0 %v359_v9  ;;  %917 = vmatpush.bf16.msra.mxu2 %v359_v9 }
  0xd0   :  { %995 = vtanh.f32 %v280_v7  ;;  %572 = vmatpush.bf16.msra.mxu1 %v360_v10  ;;  %925 = vmatpush.bf16.msra.mxu3 %v360_v10 }
  0xd2   :  { %v1382_v24 = vpop.permute.xlu1 %451 }
  0xd3   :  { %v990_v53 = vpop.eup %989  ;;  %v467_v2 = vpop.permute.xlu0 %466 }
  0xd4   :  { %v992_v55 = vpop.eup %991 }
  0xd5   :  { %v994_v11 = vpop.eup %993  ;;  %v357_v12 = vpack.c.bf16 %v990_v53, %v992_v55  ;;  %v1394_v31 = vpop.permute.xlu2 %401 }
  0xd6   :  { %v996_v13 = vpop.eup %995 }
  0xd7   :  { %524 = vmatpush.bf16.msra.mxu0 %v357_v12  ;;  %918 = vmatpush.bf16.msra.mxu2 %v357_v12  ;;  %v358_v16 = vpack.c.bf16 %v996_v13, %v994_v11 }
  0xd9   :  { %573 = vmatpush.bf16.msra.mxu1 %v358_v16  ;;  %926 = vmatpush.bf16.msra.mxu3 %v358_v16 }
  0xda   :  { %525 = vmatmul.bf16.vlgmr.msra.gmra.mxu0 %v903_v14  ;;  %550 = vmatmul.bf16.vlgmr.msra.gmra.mxu2 %v908_v15  ;;  %v1384_v26 = vpop.permute.xlu1 %446 }
  0xdb   :  { %v442_v12 = vpop.permute.xlu0 %441 }
  0xdc   :  { %574 = vmatmul.bf16.vlgmr.msra.gmra.mxu1 %v903_v14  ;;  %599 = vmatmul.bf16.vlgmr.msra.gmra.mxu3 %v908_v15 }
  0xdd   :  { %v397_v37 = vpop.permute.xlu2 %396 }
  0xe2   :  { %v1388_v28 = vpop.permute.xlu1 %421 }
  0xea   :  { %530 = vmatmul.bf16.gmra.mxu0 %v904_v17  ;;  %555 = vmatmul.bf16.gmra.mxu2 %v909_v18  ;;  %v1392_v30 = vpop.permute.xlu1 %416 }
  0xec   :  { %579 = vmatmul.bf16.gmra.mxu1 %v904_v17  ;;  %604 = vmatmul.bf16.gmra.mxu3 %v909_v18 }
  0xf2   :  { %v392_v34 = vpop.permute.xlu1 %391 }
  0xfa   :  { %535 = vmatmul.bf16.gmra.mxu0 %v905_v19  ;;  %560 = vmatmul.bf16.gmra.mxu2 %v910_v20 }
  0xfc   :  { %584 = vmatmul.bf16.gmra.mxu1 %v905_v19  ;;  %609 = vmatmul.bf16.gmra.mxu3 %v910_v20 }
 0x10a   :  { %540 = vmatmul.bf16.gmra.mxu0 %v906_v21 }
 0x10c   :  { %589 = vmatmul.bf16.gmra.mxu1 %v906_v21 }
 0x11a   :  { %545 = vmatmul.bf16.gmra.mxu0 %v907_v22 }
 0x11c   :  { %594 = vmatmul.bf16.gmra.mxu1 %v907_v22 }
 0x157   :  { %v526_v32 = vpop.f32.mrf.mxu0 }
 0x158   :  { %v527_v35 = vadd.f32 %v526_v32, %v392_v34 }
 0x159   :  { %v575_v33 = vpop.f32.mrf.mxu1 }
 0x15a   :  { %v576_v38 = vadd.f32 %v575_v33, %v392_v34  ;;  %997 = vtanh.f32 %v527_v35 }
 0x15c   :  { %999 = vtanh.f32 %v576_v38  ;;  %v437_v38 = vpop.permute.xlu0 %436 }
 0x15d   :  { %v551_v36 = vpop.f32.mrf.mxu2 }
 0x15e   :  { %v552_v18 = vadd.f32 %v551_v36, %v442_v12 }
 0x15f   :  { %v600_v39 = vpop.f32.mrf.mxu3  ;;  %v528_v40 = vpop.f32.mrf.mxu0 }
 0x160   :  { %v529_v41 = vadd.f32 %v528_v40, %v397_v37  ;;  %v1396_v46 = vpop.eup %997 }
 0x161   :  { %v577_v42 = vpop.f32.mrf.mxu1 }
 0x162   :  { %v578_v43 = vadd.f32 %v577_v42, %v397_v37  ;;  %1001 = vtanh.f32 %v529_v41  ;;  %v1400_v49 = vpop.eup %999 }
 0x164   :  { %1003 = vtanh.f32 %v578_v43 }
 0x165   :  { %v553_v45 = vpop.f32.mrf.mxu2 }
 0x166   :  { %v554_v15 = vadd.f32 %v553_v45, %v1384_v26 }
 0x167   :  { %v602_v47 = vpop.f32.mrf.mxu3  ;;  %v1398_v48 = vpop.f32.mrf.mxu0 }
 0x168   :  { %v1402_v50 = vpop.eup %1001  ;;  %v603_v20 = vadd.f32 %v602_v47, %v1384_v26 }
 0x169   :  { %v1404_v51 = vpop.f32.mrf.mxu1  ;;  %v648_v54 = vpack.c.bf16 %v1402_v50, %v1396_v46 }
 0x16a   :  { %v1406_v52 = vpop.eup %1003 }
 0x16b   :  { %v649_v56 = vpack.c.bf16 %v1406_v52, %v1400_v49 }
 0x16d   :  { %v556_v57 = vpop.f32.mrf.mxu2 }
 0x16e   :  { %v557_v53 = vadd.f32 %v556_v57, %v1382_v24 }
 0x16f   :  { %v605_v58 = vpop.f32.mrf.mxu3  ;;  %v1412_v59 = vpop.f32.mrf.mxu0 }
 0x170   :  { %v606_v17 = vadd.f32 %v605_v58, %v1382_v24 }
 0x171   :  { %v1414_v60 = vpop.f32.mrf.mxu1 }
 0x175   :  { %v558_v61 = vpop.f32.mrf.mxu2 }
 0x176   :  { %v559_v6 = vadd.f32 %v558_v61, %v457_v25 }
 0x177   :  { %v607_v62 = vpop.f32.mrf.mxu3  ;;  %v1416_v63 = vpop.f32.mrf.mxu0 }
 0x178   :  { %1005 = vtanh.f32 %v559_v6  ;;  %v608_v13 = vadd.f32 %v607_v62, %v457_v25  ;;  %v412_v62 = vpop.permute.xlu0 %411 }
 0x179   :  { %v1418_v0 = vpop.f32.mrf.mxu1 }
 0x17d   :  { %v561_v1 = vpop.f32.mrf.mxu2 }
 0x17e   :  { %v562_v7 = vadd.f32 %v561_v1, %v462_v23  ;;  %v1006_v19 = vpop.eup %1005 }
 0x17f   :  { %v610_v3 = vpop.f32.mrf.mxu3  ;;  %v1420_v4 = vpop.f32.mrf.mxu0 }
 0x180   :  { %v611_v8 = vadd.f32 %v610_v3, %v462_v23  ;;  %1007 = vtanh.f32 %v562_v7  ;;  %v601_v23 = vadd.f32 %v600_v39, %v442_v12 }
 0x181   :  { %v1422_v5 = vpop.f32.mrf.mxu1 }
 0x185   :  { %v563_v9 = vpop.f32.mrf.mxu2 }
 0x186   :  { %v564_v10 = vadd.f32 %v563_v9, %v467_v2  ;;  %v1008_v21 = vpop.eup %1007 }
 0x187   :  { %v612_v55 = vpop.f32.mrf.mxu3  ;;  %v541_v11 = vpop.f32.mrf.mxu0 }
 0x188   :  { %1009 = vtanh.f32 %v564_v10  ;;  %v613_v14 = vadd.f32 %v612_v55, %v467_v2  ;;  %v539_v55 = vadd.f32 %v1420_v4, %v1392_v30  ;;  %v586_v4 = vadd.f32 %v1418_v0, %v412_v62 }
 0x189   :  { %1011 = vtanh.f32 %v611_v8  ;;  %v590_v16 = vpop.f32.mrf.mxu1  ;;  %v542_v8 = vadd.f32 %v541_v11, %v1388_v28  ;;  %v588_v11 = vadd.f32 %v1422_v5, %v1392_v30 }
 0x18a   :  { %1013 = vtanh.f32 %v613_v14  ;;  %v591_v12 = vadd.f32 %v590_v16, %v1388_v28  ;;  %v407_v14 = vpop.permute.xlu0 %406  ;;  %v532_v28 = vadd.f32 %v1398_v48, %v1394_v31 }
 0x18b   :  { %1015 = vtanh.f32 %v557_v53 }
 0x18c   :  { %1017 = vtanh.f32 %v608_v13 }
 0x18d   :  { %1019 = vtanh.f32 %v554_v15 }
 0x18e   :  { %v1010_v22 = vpop.eup %1009  ;;  %1021 = vtanh.f32 %v606_v17 }
 0x18f   :  { %v1012_v25 = vpop.eup %1011  ;;  %1023 = vtanh.f32 %v552_v18  ;;  %v543_v32 = vpop.f32.mrf.mxu0  ;;  %v662_v33 = vpack.c.bf16 %v1010_v22, %v1008_v21 }
 0x190   :  { %v1014_v34 = vpop.eup %1013  ;;  %1025 = vtanh.f32 %v603_v20  ;;  %v544_v1 = vadd.f32 %v543_v32, %v1390_v29  ;;  %v581_v20 = vadd.f32 %v1404_v51, %v1394_v31 }
 0x191   :  { %v1016_v35 = vpop.eup %1015  ;;  %v592_v24 = vpop.f32.mrf.mxu1  ;;  %671 = vmatpush.bf16.msrb.mxu2 %v662_v33  ;;  %v663_v36 = vpack.c.bf16 %v1014_v34, %v1012_v25  ;;  %1027 = vtanh.f32 %v601_v23 }
 0x192   :  { %v1018_v37 = vpop.eup %1017  ;;  %v660_v40 = vpack.c.bf16 %v1006_v19, %v1016_v35  ;;  %1029 = vtanh.f32 %v544_v1  ;;  %v593_v10 = vadd.f32 %v592_v24, %v1390_v29  ;;  %v534_v29 = vadd.f32 %v1412_v59, %v407_v14 }
 0x193   :  { %v1020_v26 = vpop.eup %1019  ;;  %684 = vmatpush.bf16.msrb.mxu3 %v663_v36  ;;  %v583_v19 = vadd.f32 %v1414_v60, %v407_v14 }
 0x194   :  { %v1022_v41 = vpop.eup %1021 }
 0x195   :  { %v1024_v42 = vpop.eup %1023  ;;  %672 = vmatpush.bf16.msrb.mxu2 %v660_v40  ;;  %v661_v39 = vpack.c.bf16 %v1018_v37, %v1022_v41  ;;  %v647_v37 = vld [vmem:[%s1484_s6] sm:$0x3]  ;;  %v706_v40 = vpop.permute.xlu0 %705  ;;  %v700_v41 = vperm.slane %v1292_v44, 1  ;;  %s1119_s6 = smov [#allocation5]  }
 0x196   :  { %v1026_v43 = vpop.eup %1025  ;;  %v658_v47 = vpack.c.bf16 %v1020_v26, %v1024_v42  ;;  %v755_v26 = vpop.permute.xlu1 %754  ;;  %s836_s25 = sshll.u32 %s1119_s6, 4  ;;  %s837_s25 = int_to_ptr.vmem [resolvable:$true] %s836_s25 }
 0x197   :  { %685 = vmatpush.bf16.msrb.mxu3 %v661_v39  ;;  %v546_v45 = vpop.f32.mrf.mxu0  ;;  %v1028_v57 = vpop.eup %1027  ;;  %v709_v46 = vsub.f32 %v700_v41, %v706_v40  ;;  %v758_v50 = vsub.f32 %v755_v26, %v700_v41 }
 0x198   :  { %v659_v61 = vpack.c.bf16 %v1026_v43, %v1028_v57  ;;  %v547_v2 = vadd.f32 %v546_v45, %v1386_v27  ;;  %v1030_v13 = vpop.eup %1029 }
 0x199   :  { %v595_v58 = vpop.f32.mrf.mxu1  ;;  %673 = vmatpush.bf16.msrb.mxu2 %v658_v47  ;;  %v899_v45 = vmul.f32 -20.0, %v709_v46  ;;  %v902_v47 = vmul.f32 -20.0, %v758_v50 }
 0x19a   :  { %v596_v3 = vadd.f32 %v595_v58, %v1386_v27  ;;  %1031 = vtanh.f32 %v547_v2  ;;  %v537_v27 = vadd.f32 %v1416_v63, %v412_v62 }
 0x19b   :  { %686 = vmatpush.bf16.msrb.mxu3 %v659_v61  ;;  %v716_v49 = vmul.f32 1.442695, %v899_v45  ;;  %v765_v52 = vmul.f32 1.442695, %v902_v47 }
 0x19f   :  { %v548_v6 = vpop.f32.mrf.mxu0 }
 0x1a0   :  { %v549_v7 = vadd.f32 %v548_v6, %v437_v38  ;;  %v1032_v15 = vpop.eup %1031 }
 0x1a1   :  { %v597_v9 = vpop.f32.mrf.mxu1 }
 0x1a2   :  { %1033 = vtanh.f32 %v549_v7  ;;  %v598_v53 = vadd.f32 %v597_v9, %v437_v38  ;;  %v699_v38 = vperm.slane %v1292_v44, 0 }
 0x1a3   :  { %1035 = vtanh.f32 %v596_v3 }
 0x1a4   :  { %1037 = vtanh.f32 %v598_v53  ;;  %v757_v42 = vsub.f32 %v755_v26, %v699_v38  ;;  %v708_v39 = vsub.f32 %v699_v38, %v706_v40  ;;  %v669_v26 = vpop.permute.xlu2 %668 }
 0x1a5   :  { %1039 = vtanh.f32 %v542_v8 }
 0x1a6   :  { %1041 = vtanh.f32 %v593_v10  ;;  %v898_v43 = vmul.f32 -20.0, %v708_v39 }
 0x1a7   :  { %1043 = vtanh.f32 %v539_v55 }
 0x1a8   :  { %v1034_v17 = vpop.eup %1033  ;;  %1045 = vtanh.f32 %v591_v12  ;;  %v714_v58 = vmul.f32 1.442695, %v898_v43 }
 0x1a9   :  { %v1036_v18 = vpop.eup %1035  ;;  %1047 = vtanh.f32 %v537_v27  ;;  %v656_v63 = vpack.c.bf16 %v1034_v17, %v1032_v15 }
 0x1aa   :  { %v1038_v16 = vpop.eup %1037  ;;  %1049 = vtanh.f32 %v588_v11 }
 0x1ab   :  { %v1040_v30 = vpop.eup %1039  ;;  %1051 = vtanh.f32 %v534_v29  ;;  %674 = vmatpush.bf16.msrb.mxu2 %v656_v63  ;;  %v657_v5 = vpack.c.bf16 %v1038_v16, %v1036_v18 }
 0x1ac   :  { %v1042_v59 = vpop.eup %1041  ;;  %1053 = vtanh.f32 %v586_v4  ;;  %v654_v21 = vpack.c.bf16 %v1030_v13, %v1040_v30 }
 0x1ad   :  { %v1044_v0 = vpop.eup %1043  ;;  %1055 = vtanh.f32 %v532_v28  ;;  %687 = vmatpush.bf16.msrb.mxu3 %v657_v5 }
 0x1ae   :  { %v1046_v48 = vpop.eup %1045  ;;  %1057 = vtanh.f32 %v583_v19 }
 0x1af   :  { %v1048_v22 = vpop.eup %1047  ;;  %675 = vmatpush.bf16.msrb.mxu2 %v654_v21  ;;  %v655_v23 = vpack.c.bf16 %v1042_v59, %v1046_v48  ;;  %1059 = vtanh.f32 %v581_v20 }
 0x1b0   :  { %v1050_v60 = vpop.eup %1049  ;;  %v652_v32 = vpack.c.bf16 %v1044_v0, %v1048_v22 }
 0x1b1   :  { %v1052_v25 = vpop.eup %1051  ;;  %688 = vmatpush.bf16.msrb.mxu3 %v655_v23 }
 0x1b2   :  { %v1054_v33 = vpop.eup %1053 }
 0x1b3   :  { %v1056_v34 = vpop.eup %1055  ;;  %676 = vmatpush.bf16.msrb.mxu2 %v652_v32  ;;  %v653_v35 = vpack.c.bf16 %v1050_v60, %v1054_v33 }
 0x1b4   :  { %v1058_v31 = vpop.eup %1057  ;;  %v650_v51 = vpack.c.bf16 %v1052_v25, %v1056_v34 }
 0x1b5   :  { %689 = vmatpush.bf16.msrb.mxu3 %v653_v35  ;;  %v1060_v24 = vpop.eup %1059 }
 0x1b6   :  { %v651_v36 = vpack.c.bf16 %v1058_v31, %v1060_v24 }
 0x1b7   :  { %677 = vmatpush.bf16.msrb.mxu2 %v650_v51 }
 0x1b9   :  { %690 = vmatpush.bf16.msrb.mxu3 %v651_v36 }
 0x1bb   :  { %678 = vmatpush.bf16.msrb.mxu2 %v648_v54  ;;  %v901_v54 = vmul.f32 -20.0, %v757_v42 }
 0x1bd   :  { %691 = vmatpush.bf16.msrb.mxu3 %v649_v56  ;;  %v763_v57 = vmul.f32 1.442695, %v901_v54 }
 0x1be   :  { %679 = vmatmul.bf16.vlgmr.msrb.gmra.mxu2 %v647_v37 }
 0x1bf   :  { %1061 = vpow2.f32 %v763_v57 }
 0x1c0   :  { %692 = vmatmul.bf16.vlgmr.msrb.gmra.mxu3 %v647_v37  ;;  %1063 = vpow2.f32 %v714_v58 }
 0x1c1   :  { %1065 = vpow2.f32 %v716_v49 }
 0x1c2   :  { %1067 = vpow2.f32 %v765_v52 }
 0x1c5   :  { %v1062_v56 = vpop.eup %1061 }
 0x1c6   :  { %v1064_v61 = vpop.eup %1063  ;;  %v767_v1 = vadd.f32 1.0, %v1062_v56 }
 0x1c7   :  { %v1066_v62 = vpop.eup %1065  ;;  %v718_v2 = vadd.f32 1.0, %v1064_v61 }
 0x1c8   :  { %v1068_v44 = vpop.eup %1067  ;;  %v719_v3 = vadd.f32 1.0, %v1066_v62  ;;  %1069 = vrcp.f32 %v767_v1  ;;  %vm774_vm0 = vweird.f32 %v767_v1  ;;  %v778_v16 = vand.u32 2147483647, %v767_v1 }
 0x1c9   :  { %v768_v6 = vadd.f32 1.0, %v1068_v44  ;;  %1071 = vrcp.f32 %v718_v2  ;;  %vm725_vm3 = vweird.f32 %v718_v2  ;;  %v731_v19 = vand.u32 2147483648, %v718_v2 }
 0x1ca   :  { %1073 = vrcp.f32 %v719_v3  ;;  %v780_v30 = vand.u32 2147483648, %v767_v1  ;;  %v729_v5 = vand.u32 2147483647, %v718_v2  ;;  %vm740_vm8 = vweird.f32 %v719_v3 }
 0x1cb   :  { %1075 = vrcp.f32 %v768_v6  ;;  %v744_v48 = vand.u32 2147483647, %v719_v3  ;;  %v746_v22 = vand.u32 2147483648, %v719_v3  ;;  %v795_v23 = vand.u32 2147483648, %v768_v6 }
 0x1cc   :  { %vm789_vm10 = vweird.f32 %v768_v6  ;;  %v793_v33 = vand.u32 2147483647, %v768_v6  ;;  %v732_v34 = vor.u32 1.1754944e-38, %v731_v19  ;;  %v781_v35 = vor.u32 1.1754944e-38, %v780_v30 }
 0x1cd   :  { %vm730_vm12 = vcmp.eq.f32.partialorder %v729_v5, 8.507059e+37  ;;  %vm779_vm13 = vcmp.eq.f32.partialorder %v778_v16, 8.507059e+37  ;;  %v747_v37 = vor.u32 1.1754944e-38, %v746_v22  ;;  %v796_v38 = vor.u32 1.1754944e-38, %v795_v23 }
 0x1ce   :  { %v1070_v7 = vpop.eup %1069  ;;  %vm745_vm14 = vcmp.eq.f32.partialorder %v744_v48, 8.507059e+37  ;;  %vm794_vm15 = vcmp.eq.f32.partialorder %v793_v33, 8.507059e+37 }
 0x1cf   :  { %v1072_v8 = vpop.eup %1071  ;;  %v770_v55 = vmul.f32 %v1070_v7, %v767_v1  ;;  %vm775_vm1 = vweird.f32 %v1070_v7 }
 0x1d0   :  { %v1074_v9 = vpop.eup %1073  ;;  %v721_v53 = vmul.f32 %v1072_v8, %v718_v2  ;;  %vm726_vm2 = vweird.f32 %v1072_v8  ;;  %vm1457_vm5 = vmor %vm774_vm0, %vm775_vm1  ;;  %vm803_vm0 = vcmask 1043456   ;;  %vm823_vm1 = vcmask 1040384  }
 0x1d1   :  { %v1076_v10 = vpop.eup %1075  ;;  %v736_v12 = vmul.f32 %v1074_v9, %v719_v3  ;;  %v771_v14 = vsub.f32 1.0, %v770_v55  ;;  %vm741_vm4 = vweird.f32 %v1074_v9  ;;  %vm1461_vm7 = vmor %vm725_vm3, %vm726_vm2 }
 0x1d2   :  { %v785_v27 = vmul.f32 %v1076_v10, %v768_v6  ;;  %v722_v13 = vsub.f32 1.0, %v721_v53  ;;  %vm790_vm6 = vweird.f32 %v1076_v10  ;;  %vm1469_vm9 = vmor %vm740_vm8, %vm741_vm4  ;;  %v826_v53 = vlaneseq }
 0x1d3   :  { %v737_v11 = vsub.f32 1.0, %v736_v12  ;;  %v772_v17 = vmul.f32 %v1070_v7, %v771_v14  ;;  %vm791_vm11 = vmor %vm789_vm10, %vm790_vm6 }
 0x1d4   :  { %v786_v15 = vsub.f32 1.0, %v785_v27  ;;  %v723_v29 = vmul.f32 %v1072_v8, %v722_v13  ;;  %vm828_vm2 = vcmp.lt.s32.totalorder %v826_v53, 256 }
 0x1d5   :  { %v738_v4 = vmul.f32 %v1074_v9, %v737_v11  ;;  %v773_v63 = vadd.f32 %v1070_v7, %v772_v17 }
 0x1d6   :  { %v787_v18 = vmul.f32 %v1076_v10, %v786_v15  ;;  %v724_v28 = vadd.f32 %v1072_v8, %v723_v29 }
 0x1d7   :  { %v739_v20 = vadd.f32 %v1074_v9, %v738_v4  ;;  %v777_v25 = vsel %vm1457_vm5, %v1070_v7, %v773_v63 }
 0x1d8   :  { %v788_v0 = vadd.f32 %v1076_v10, %v787_v18  ;;  %v728_v60 = vsel %vm1461_vm7, %v1072_v8, %v724_v28  ;;  %v782_v36 = vsel %vm779_vm13, %v781_v35, %v777_v25 }
 0x1d9   :  { %v743_v31 = vsel %vm1469_vm9, %v1074_v9, %v739_v20  ;;  %v733_v24 = vsel %vm730_vm12, %v732_v34, %v728_v60 }
 0x1da   :  { %v792_v51 = vsel %vm791_vm11, %v1076_v10, %v788_v0  ;;  %v748_v41 = vsel %vm745_vm14, %v747_v37, %v743_v31  ;;  %v799_v46 = vmul.f32 %v782_v36, %v733_v24 }
 0x1db   :  { %v797_v42 = vsel %vm794_vm15, %v796_v38, %v792_v51 }
 0x1dc   :  { %v800_v45 = vmul.f32 %v797_v42, %v748_v41 }
 0x241   :  { %v680_v40 = vpop.f32.mrf.mxu2 }
 0x242   :  { %v681_v39 = vadd.f32 %v680_v40, %v669_v26 }
 0x243   :  { %v693_v50 = vpop.f32.mrf.mxu3 }
 0x244   :  { %v801_v54 = vmul.f32 %v799_v46, %v681_v39  ;;  %v694_v43 = vadd.f32 %v693_v50, %v669_v26 }
 0x246   :  { %v804_v47 = vsel %vm803_vm0, %v801_v54, 0.0  ;;  %v802_v57 = vmul.f32 %v800_v45, %v694_v43 }
 0x247   :  { %v805_v58 = vrot.slane %v804_v47, 4 }
 0x248   :  { %v811_v49 = vsel %vm803_vm0, %v802_v57, 0.0 }
 0x249   :  { %v806_v52 = vadd.f32 %v805_v58, %v804_v47  ;;  %v812_v56 = vrot.slane %v811_v49, 4  ;;  %v682_v61 = vpop.f32.mrf.mxu2 }
 0x24b   :  { %v807_v62 = vrot.slane %v806_v52, 2  ;;  %v813_v44 = vadd.f32 %v812_v56, %v811_v49  ;;  %v695_v1 = vpop.f32.mrf.mxu3 }
 0x24d   :  { %v808_v2 = vadd.f32 %v807_v62, %v806_v52  ;;  %v814_v3 = vrot.slane %v813_v44, 2 }
 0x24f   :  { %v809_v6 = vrot.slane %v808_v2, 1  ;;  %v815_v7 = vadd.f32 %v814_v3, %v813_v44 }
 0x251   :  { %v816_v8 = vrot.slane %v815_v7, 1  ;;  %v810_v9 = vadd.f32 %v809_v6, %v808_v2 }
 0x253   :  { %v817_v10 = vadd.f32 %v816_v8, %v815_v7  ;;  %v818_v12 = vmul.f32 0.06666667, %v810_v9 }
 0x255   :  { %v819_v55 = vmul.f32 0.06666667, %v817_v10 }
 0x257   :  { %v822_v27 = vrot.slane %v819_v55, 7 }
 0x259   :  { %v824_v13 = vsel %vm823_vm1, %v818_v12, %v822_v27 }
 0x25a   :  { %830 = vst.msk [vmem:[#allocation5] sm:$0x3] %vm828_vm2, %v824_v13 }
 0x25b   :  { %841 = dma.vmem_to_hbm [thread:$0]  %s837_s25, 32, %s839_s3, [#allocation3]  }
 0x25c   :  { %1115 = dma.done.wait [#allocation3], 32  }
 0x25d   :  { %1116 = vsyncadd [#allocation3], 4294967264 }
 0x25e   :  { %846 = vsyncpa [#allocation3], 1 }
 0x25f   :  { %847 = vsyncpa [#allocation4], 1 }

</bundles_post_ra>
